<compile_context>
chip_gen: v6e
topology: v6e:2x2x1
jax: 0.10.0
libtpu: 0.0.40
codegen_flags: <defaults>
</compile_context>

<pallas_src>
import functools

import jax
import jax.numpy as jnp
from jax.experimental import pallas as pl
from jax.experimental.pallas import tpu as pltpu


_LANE = 128       # lane width (last-dim alignment)
_SUBLANE = 16     # row-tile granularity (covers bf16 sublane packing; >= 8 for f32)


def _round_up(v, m):
    return (v + m - 1) // m * m


def _pad_axis(a, axis, target):
    if a.shape[axis] == target:
        return a
    widths = [(0, 0)] * a.ndim
    widths[axis] = (0, target - a.shape[axis])
    return jnp.pad(a, widths)


def _mlp_kernel(x_ref, w1_ref, b1_ref, w2_ref, b2_ref, o_ref):
    # x_ref:  (TM, D_in)       current row tile
    # w1_ref: (D_in, D_hid)    resident in VMEM (constant index_map -> one DMA)
    # b1_ref: (1, D_hid)
    # w2_ref: (D_hid, D_out)   resident in VMEM
    # b2_ref: (1, D_out)
    # o_ref:  (TM, D_out)

    # fc1: native-dtype operands straight to the MXU, f32 accumulation.
    h = jnp.dot(x_ref[...], w1_ref[...], preferred_element_type=jnp.float32)
    h = h + b1_ref[...].astype(jnp.float32)

    # Exact (erf-based) GELU, matching torch.nn.GELU() default.
    h = 0.5 * h * (1.0 + jax.lax.erf(h * 0.7071067811865476))

    # fc2: cast only the tile-sized hidden activation to the weight dtype
    # (no-op for f32 weights; bf16 weights hit the fast bf16 MXU path).
    y = jnp.dot(h.astype(w2_ref.dtype), w2_ref[...],
                preferred_element_type=jnp.float32)
    y = y + b2_ref[...].astype(jnp.float32)

    o_ref[...] = y.astype(o_ref.dtype)


@functools.partial(jax.jit, static_argnames=("tile_m",))
def mlp_pallas(x, w1, b1, w2, b2, *, tile_m=256):
    """x: (..., D_in) -> (..., D_out).  Weights in (in, out) layout."""
    orig_shape = x.shape
    d_in = orig_shape[-1]
    d_hid = w1.shape[1]
    d_out = w2.shape[1]

    # Lane-align feature dims (no-op when already multiples of 128).
    d_in_p = _round_up(d_in, _LANE)
    d_hid_p = _round_up(d_hid, _LANE)
    d_out_p = _round_up(d_out, _LANE)

    x2d = x.reshape(-1, d_in)
    m = x2d.shape[0]

    x2d = _pad_axis(x2d, 1, d_in_p)
    w1p = _pad_axis(_pad_axis(w1, 0, d_in_p), 1, d_hid_p)
    b1p = _pad_axis(b1.reshape(1, d_hid), 1, d_hid_p)
    w2p = _pad_axis(_pad_axis(w2, 0, d_hid_p), 1, d_out_p)
    b2p = _pad_axis(b2.reshape(1, d_out), 1, d_out_p)

    # Row tile: large enough to fill the MXU / amortize per-step overhead,
    # but no bigger than the (rounded-up) row count.  No HBM row padding --
    # Pallas masks the ragged last block; tail rows are never stored.
    tm = min(_round_up(tile_m, _SUBLANE), _round_up(m, _SUBLANE))
    grid = (pl.cdiv(m, tm),)

    # VMEM budget: double-buffered row tiles + resident (double-buffered)
    # weights + f32 hidden activation.  Cap at 64 MiB = v7x physical VMEM.
    bpe = lambda a: a.dtype.itemsize
    est = (2 * (d_in_p * d_hid_p * bpe(w1) + d_hid_p * d_out_p * bpe(w2)
                + d_hid_p * bpe(b1) + d_out_p * bpe(b2)
                + tm * d_in_p * bpe(x) + tm * d_out_p * bpe(x))
           + tm * d_hid_p * 4)
    vmem_limit = int(min(max(1.5 * est + (1 << 20), 32 << 20), 64 << 20))
    # TODO(synk): for hidden dims so large that resident weights exceed the
    # v7x VMEM budget, add an 'arbitrary' hidden-dim grid axis with an f32
    # accumulator scratch instead of keeping both weight matrices resident.

    out = pl.pallas_call(
        _mlp_kernel,
        out_shape=jax.ShapeDtypeStruct((m, d_out_p), x.dtype),
        grid_spec=pltpu.PrefetchScalarGridSpec(
            num_scalar_prefetch=0,
            grid=grid,
            in_specs=[
                pl.BlockSpec((tm, d_in_p), lambda i: (i, 0)),        # x row tile
                pl.BlockSpec((d_in_p, d_hid_p), lambda i: (0, 0)),   # w1 (resident)
                pl.BlockSpec((1, d_hid_p), lambda i: (0, 0)),        # b1
                pl.BlockSpec((d_hid_p, d_out_p), lambda i: (0, 0)),  # w2 (resident)
                pl.BlockSpec((1, d_out_p), lambda i: (0, 0)),        # b2
            ],
            out_specs=pl.BlockSpec((tm, d_out_p), lambda i: (i, 0)),
        ),
        compiler_params=pltpu.CompilerParams(
            dimension_semantics=("parallel",),
            vmem_limit_bytes=vmem_limit),
    )(x2d, w1p, b1p, w2p, b2p)

    if d_out_p != d_out:
        out = out[:, :d_out]
    return out.reshape(*orig_shape[:-1], d_out)


def _reference(x, w1, b1, w2, b2):
    h = jnp.dot(x, w1) + b1
    h = jax.nn.gelu(h, approximate=False)
    return jnp.dot(h, w2) + b2


if __name__ == "__main__":
    # Mlp(in_features=32, hidden_features=64, out_features=32), drop=0.0
    B, N = 2, 8          # batch, sequence (tokens)
    D_IN, D_HID, D_OUT = 32, 64, 32

    key = jax.random.PRNGKey(0)
    kx, k1, k2, k3, k4 = jax.random.split(key, 5)

    x = jax.random.normal(kx, (B, N, D_IN), dtype=jnp.float32)
    # deterministic parameter init (torch-Linear-like uniform scale)
    w1 = jax.random.uniform(k1, (D_IN, D_HID), jnp.float32,
                            -1.0 / jnp.sqrt(D_IN), 1.0 / jnp.sqrt(D_IN))
    b1 = jax.random.uniform(k2, (D_HID,), jnp.float32,
                            -1.0 / jnp.sqrt(D_IN), 1.0 / jnp.sqrt(D_IN))
    w2 = jax.random.uniform(k3, (D_HID, D_OUT), jnp.float32,
                            -1.0 / jnp.sqrt(D_HID), 1.0 / jnp.sqrt(D_HID))
    b2 = jax.random.uniform(k4, (D_OUT,), jnp.float32,
                            -1.0 / jnp.sqrt(D_HID), 1.0 / jnp.sqrt(D_HID))

    y = mlp_pallas(x, w1, b1, w2, b2)
    jax.block_until_ready(y)

    y_ref = _reference(x, w1, b1, w2, b2)
    assert y.shape == (B, N, D_OUT), y.shape
    assert jnp.allclose(y, y_ref, atol=1e-4, rtol=1e-4), \
        float(jnp.max(jnp.abs(y - y_ref)))

    print("KERNEL_OK")
</pallas_src>

<mosaic_0001>
module attributes {stable_mosaic.version = 11 : i64} {
  func.func @_mlp_kernel(%arg0: i32, %arg1: memref<16x128xf32, #tpu.memory_space<vmem>>, %arg2: memref<128x128xf32, #tpu.memory_space<vmem>>, %arg3: memref<1x128xf32, #tpu.memory_space<vmem>>, %arg4: memref<128x128xf32, #tpu.memory_space<vmem>>, %arg5: memref<1x128xf32, #tpu.memory_space<vmem>>, %arg6: memref<16x128xf32, #tpu.memory_space<vmem>>) attributes {dimension_semantics = [#tpu.dimension_semantics<parallel>], iteration_bounds = array<i64: 1>, scalar_prefetch = 0 : i64, scratch_operands = 0 : i64, tpu.core_type = #tpu.core_type<tc>, window_params = [{transform_indices = @transform_0, window_bounds = array<i64: 16, 128>}, {pipeline_mode = #tpu.pipeline_mode<synchronous>, transform_indices = @transform_1, window_bounds = array<i64: 128, 128>}, {pipeline_mode = #tpu.pipeline_mode<synchronous>, transform_indices = @transform_2, window_bounds = array<i64: 1, 128>}, {pipeline_mode = #tpu.pipeline_mode<synchronous>, transform_indices = @transform_3, window_bounds = array<i64: 128, 128>}, {pipeline_mode = #tpu.pipeline_mode<synchronous>, transform_indices = @transform_4, window_bounds = array<i64: 1, 128>}, {transform_indices = @transform_5, window_bounds = array<i64: 16, 128>}]} {
    %c0 = arith.constant 0 : index
    %c0_0 = arith.constant 0 : index
    %0 = vector.load %arg1[%c0, %c0_0] : memref<16x128xf32, #tpu.memory_space<vmem>>, vector<16x128xf32>
    %c0_1 = arith.constant 0 : index
    %c0_2 = arith.constant 0 : index
    %1 = vector.load %arg2[%c0_1, %c0_2] : memref<128x128xf32, #tpu.memory_space<vmem>>, vector<128x128xf32>
    %cst = arith.constant dense<0.000000e+00> : vector<16x128xf32>
    %2 = tpu.matmul %0, %1, %cst {dimension_numbers = #tpu.dot_dimension_numbers<[1], [0], [0], [1], [0, 0, 1, 1], [], []>} : vector<16x128xf32>, vector<128x128xf32>, vector<16x128xf32> -> vector<16x128xf32>
    %c0_3 = arith.constant 0 : index
    %c0_4 = arith.constant 0 : index
    %3 = vector.load %arg3[%c0_3, %c0_4] : memref<1x128xf32, #tpu.memory_space<vmem>>, vector<1x128xf32>
    %4 = vector.broadcast %3 : vector<1x128xf32> to vector<16x128xf32>
    %5 = arith.addf %2, %4 : vector<16x128xf32>
    %cst_5 = arith.constant 5.000000e-01 : f32
    %6 = vector.broadcast %cst_5 : f32 to vector<16x128xf32>
    %7 = arith.mulf %6, %5 : vector<16x128xf32>
    %cst_6 = arith.constant 0.707106769 : f32
    %8 = vector.broadcast %cst_6 : f32 to vector<16x128xf32>
    %9 = arith.mulf %5, %8 : vector<16x128xf32>
    %10 = math.erf %9 : vector<16x128xf32>
    %cst_7 = arith.constant 1.000000e+00 : f32
    %11 = vector.broadcast %cst_7 : f32 to vector<16x128xf32>
    %12 = arith.addf %11, %10 : vector<16x128xf32>
    %13 = arith.mulf %7, %12 : vector<16x128xf32>
    %c0_8 = arith.constant 0 : index
    %c0_9 = arith.constant 0 : index
    %14 = vector.load %arg4[%c0_8, %c0_9] : memref<128x128xf32, #tpu.memory_space<vmem>>, vector<128x128xf32>
    %cst_10 = arith.constant dense<0.000000e+00> : vector<16x128xf32>
    %15 = tpu.matmul %13, %14, %cst_10 {dimension_numbers = #tpu.dot_dimension_numbers<[1], [0], [0], [1], [0, 0, 1, 1], [], []>} : vector<16x128xf32>, vector<128x128xf32>, vector<16x128xf32> -> vector<16x128xf32>
    %c0_11 = arith.constant 0 : index
    %c0_12 = arith.constant 0 : index
    %16 = vector.load %arg5[%c0_11, %c0_12] : memref<1x128xf32, #tpu.memory_space<vmem>>, vector<1x128xf32>
    %17 = vector.broadcast %16 : vector<1x128xf32> to vector<16x128xf32>
    %18 = arith.addf %15, %17 : vector<16x128xf32>
    %c0_13 = arith.constant 0 : index
    %c0_14 = arith.constant 0 : index
    %19 = vector.load %arg6[%c0_13, %c0_14] : memref<16x128xf32, #tpu.memory_space<vmem>>, vector<16x128xf32>
    tpu.vector_store %arg6[%c0_13, %c0_14], %18 {strides = array<i32>} : memref<16x128xf32, #tpu.memory_space<vmem>>, vector<16x128xf32>,
    return
  }
  func.func @transform_0(%arg0: i32) -> (i32, i32) {
    %c0_i32 = arith.constant 0 : i32
    %c0_i32_0 = arith.constant 0 : i32
    return %arg0, %c0_i32 : i32, i32
  }
  func.func @transform_1(%arg0: i32) -> (i32, i32) {
    %c0_i32 = arith.constant 0 : i32
    %c0_i32_0 = arith.constant 0 : i32
    %c0_i32_1 = arith.constant 0 : i32
    return %c0_i32, %c0_i32_0 : i32, i32
  }
  func.func @transform_2(%arg0: i32) -> (i32, i32) {
    %c0_i32 = arith.constant 0 : i32
    %c0_i32_0 = arith.constant 0 : i32
    %c0_i32_1 = arith.constant 0 : i32
    return %c0_i32, %c0_i32_0 : i32, i32
  }
  func.func @transform_3(%arg0: i32) -> (i32, i32) {
    %c0_i32 = arith.constant 0 : i32
    %c0_i32_0 = arith.constant 0 : i32
    %c0_i32_1 = arith.constant 0 : i32
    return %c0_i32, %c0_i32_0 : i32, i32
  }
  func.func @transform_4(%arg0: i32) -> (i32, i32) {
    %c0_i32 = arith.constant 0 : i32
    %c0_i32_0 = arith.constant 0 : i32
    %c0_i32_1 = arith.constant 0 : i32
    return %c0_i32, %c0_i32_0 : i32, i32
  }
  func.func @transform_5(%arg0: i32) -> (i32, i32) {
    %c0_i32 = arith.constant 0 : i32
    %c0_i32_0 = arith.constant 0 : i32
    return %arg0, %c0_i32 : i32, i32
  }
}

</mosaic_0001>

<bundles_post_ra>
// kernel: mlp_pallas.1
= control target key start
LH: loop header
LB: loop body
LE: loop exit
PB: predicated region body
PF: predicated region fallthrough
CT: control target
= control target key end

     0   :  { %s490_s1 = inlined_call_operand.vmem [shape: f32[128,128], index: 1, kind: input, shape index: {}]   ;;  %s491_s0 = inlined_call_operand.vmem [shape: f32[16,128], index: 0, kind: input, shape index: {}]   ;;  %s492_s3 = inlined_call_operand.vmem [shape: f32[128,128], index: 3, kind: input, shape index: {}]   ;;  %s493_s2 = inlined_call_operand.vmem [shape: f32[1,128], index: 2, kind: input, shape index: {}]   ;;  %s494_s4 = inlined_call_operand.vmem [shape: f32[1,128], index: 4, kind: input, shape index: {}]   ;;  %s495_s5 = inlined_call_operand.vmem [shape: f32[16,128], index: 5, kind: output, shape index: {}]  }
   0x1   :  { %v37_v0 = vld [vmem:[%s490_s1 + $0x78] sm:$0xff]  ;;  %v36_v1 = vld [vmem:[%s490_s1 + $0x70] sm:$0xff]  ;;  %v35_v2 = vld [vmem:[%s490_s1 + $0x68] sm:$0xff] }
   0x2   :  { %272 = vmatprep.subr.mxu0 %v37_v0  ;;  %v34_v3 = vld [vmem:[%s490_s1 + $0x60] sm:$0xff]  ;;  %v33_v5 = vld [vmem:[%s490_s1 + $0x58] sm:$0xff]  ;;  %v144_v7 = vld [vmem:[%s492_s3 + $0x70] sm:$0xff] }
   0x3   :  { %273 = vmatpush3.msra.mxu0 %v37_v0  ;;  %v20_v4 = vld [vmem:[%s491_s0] sm:$0xff]  ;;  %v145_v6 = vld [vmem:[%s492_s3 + $0x78] sm:$0xff]  ;;  %v32_v8 = vld [vmem:[%s490_s1 + $0x50] sm:$0xff] }
   0x4   :  { %274 = vmatprep.subr.mxu0 %v36_v1  ;;  %304 = vmatprep.mubr.f32.mxu0 %v20_v4  ;;  %v143_v9 = vld [vmem:[%s492_s3 + $0x68] sm:$0xff]  ;;  %v30_v11 = vld [vmem:[%s490_s1 + $0x40] sm:$0xff]  ;;  %v29_v12 = vld [vmem:[%s490_s1 + $0x38] sm:$0xff] }
   0x5   :  { %275 = vmatpush3.msra.mxu0 %v36_v1  ;;  %307 = vmatprep.subr.mxu1 %v145_v6  ;;  %v31_v10 = vld [vmem:[%s490_s1 + $0x48] sm:$0xff]  ;;  %v28_v13 = vld [vmem:[%s490_s1 + $0x30] sm:$0xff]  ;;  %v26_v15 = vld [vmem:[%s490_s1 + $0x20] sm:$0xff] }
   0x6   :  { %276 = vmatprep.subr.mxu0 %v35_v2  ;;  %308 = vmatpush3.msra.mxu1 %v145_v6  ;;  %v27_v14 = vld [vmem:[%s490_s1 + $0x28] sm:$0xff]  ;;  %v25_v16 = vld [vmem:[%s490_s1 + $0x18] sm:$0xff]  ;;  %v24_v17 = vld [vmem:[%s490_s1 + $0x10] sm:$0xff] }
   0x7   :  { %277 = vmatpush3.msra.mxu0 %v35_v2  ;;  %309 = vmatprep.subr.mxu1 %v144_v7  ;;  %v23_v18 = vld [vmem:[%s490_s1 + $0x8] sm:$0xff]  ;;  %v22_v19 = vld [vmem:[%s490_s1] sm:$0xff]  ;;  %v141_v22 = vld [vmem:[%s492_s3 + $0x58] sm:$0xff] }
   0x8   :  { %278 = vmatprep.subr.mxu0 %v34_v3  ;;  %310 = vmatpush3.msra.mxu1 %v144_v7  ;;  %v21_v20 = vld [vmem:[%s491_s0 + $0x8] sm:$0xff]  ;;  %v142_v21 = vld [vmem:[%s492_s3 + $0x60] sm:$0xff]  ;;  %v140_v23 = vld [vmem:[%s492_s3 + $0x50] sm:$0xff] }
   0x9   :  { %279 = vmatpush3.msra.mxu0 %v34_v3  ;;  %311 = vmatprep.subr.mxu1 %v143_v9  ;;  %v139_v24 = vld [vmem:[%s492_s3 + $0x48] sm:$0xff]  ;;  %v138_v25 = vld [vmem:[%s492_s3 + $0x40] sm:$0xff]  ;;  %v137_v26 = vld [vmem:[%s492_s3 + $0x38] sm:$0xff] }
   0xa   :  { %280 = vmatprep.subr.mxu0 %v33_v5  ;;  %312 = vmatpush3.msra.mxu1 %v143_v9  ;;  %v136_v27 = vld [vmem:[%s492_s3 + $0x30] sm:$0xff]  ;;  %v135_v28 = vld [vmem:[%s492_s3 + $0x28] sm:$0xff]  ;;  %v134_v29 = vld [vmem:[%s492_s3 + $0x20] sm:$0xff] }
   0xb   :  { %281 = vmatpush3.msra.mxu0 %v33_v5  ;;  %313 = vmatprep.subr.mxu1 %v142_v21  ;;  %v133_v30 = vld [vmem:[%s492_s3 + $0x18] sm:$0xff]  ;;  %v132_v31 = vld [vmem:[%s492_s3 + $0x10] sm:$0xff]  ;;  %v131_v32 = vld [vmem:[%s492_s3 + $0x8] sm:$0xff] }
   0xc   :  { %282 = vmatprep.subr.mxu0 %v32_v8  ;;  %314 = vmatpush3.msra.mxu1 %v142_v21  ;;  %v130_v33 = vld [vmem:[%s492_s3] sm:$0xff] }
   0xd   :  { %283 = vmatpush3.msra.mxu0 %v32_v8  ;;  %315 = vmatprep.subr.mxu1 %v141_v22  ;;  %v234_v34 = vld [vmem:[%s493_s2] ss:$0 sm:$0xff] }
   0xe   :  { %284 = vmatprep.subr.mxu0 %v31_v10  ;;  %316 = vmatpush3.msra.mxu1 %v141_v22  ;;  %v235_v49 = vld [vmem:[%s494_s4] ss:$0 sm:$0xff] }
   0xf   :  { %285 = vmatpush3.msra.mxu0 %v31_v10  ;;  %317 = vmatprep.subr.mxu1 %v140_v23 }
  0x10   :  { %286 = vmatprep.subr.mxu0 %v30_v11  ;;  %318 = vmatpush3.msra.mxu1 %v140_v23 }
  0x11   :  { %287 = vmatpush3.msra.mxu0 %v30_v11  ;;  %319 = vmatprep.subr.mxu1 %v139_v24 }
  0x12   :  { %288 = vmatprep.subr.mxu0 %v29_v12  ;;  %320 = vmatpush3.msra.mxu1 %v139_v24 }
  0x13   :  { %289 = vmatpush3.msra.mxu0 %v29_v12  ;;  %321 = vmatprep.subr.mxu1 %v138_v25 }
  0x14   :  { %290 = vmatprep.subr.mxu0 %v28_v13  ;;  %322 = vmatpush3.msra.mxu1 %v138_v25 }
  0x15   :  { %291 = vmatpush3.msra.mxu0 %v28_v13  ;;  %323 = vmatprep.subr.mxu1 %v137_v26 }
  0x16   :  { %292 = vmatprep.subr.mxu0 %v27_v14  ;;  %324 = vmatpush3.msra.mxu1 %v137_v26 }
  0x17   :  { %293 = vmatpush3.msra.mxu0 %v27_v14  ;;  %325 = vmatprep.subr.mxu1 %v136_v27 }
  0x18   :  { %294 = vmatprep.subr.mxu0 %v26_v15  ;;  %326 = vmatpush3.msra.mxu1 %v136_v27 }
  0x19   :  { %295 = vmatpush3.msra.mxu0 %v26_v15  ;;  %327 = vmatprep.subr.mxu1 %v135_v28 }
  0x1a   :  { %296 = vmatprep.subr.mxu0 %v25_v16  ;;  %328 = vmatpush3.msra.mxu1 %v135_v28 }
  0x1b   :  { %297 = vmatpush3.msra.mxu0 %v25_v16  ;;  %329 = vmatprep.subr.mxu1 %v134_v29 }
  0x1c   :  { %298 = vmatprep.subr.mxu0 %v24_v17  ;;  %330 = vmatpush3.msra.mxu1 %v134_v29 }
  0x1d   :  { %299 = vmatpush3.msra.mxu0 %v24_v17  ;;  %331 = vmatprep.subr.mxu1 %v133_v30 }
  0x1e   :  { %300 = vmatprep.subr.mxu0 %v23_v18  ;;  %332 = vmatpush3.msra.mxu1 %v133_v30 }
  0x1f   :  { %301 = vmatpush3.msra.mxu0 %v23_v18  ;;  %333 = vmatprep.subr.mxu1 %v132_v31 }
  0x20   :  { %302 = vmatprep.subr.mxu0 %v22_v19  ;;  %334 = vmatpush3.msra.mxu1 %v132_v31 }
  0x21   :  { %303 = vmatpush3.msra.mxu0 %v22_v19  ;;  %335 = vmatprep.subr.mxu1 %v131_v32 }
  0x22   :  { %305 = vmatmul.mubr.f32.vlgmr.msra.gmra.mxu0 %v21_v20  ;;  %336 = vmatpush3.msra.mxu1 %v131_v32 }
  0x23   :  { %337 = vmatprep.subr.mxu1 %v130_v33 }
  0x24   :  { %338 = vmatpush3.msra.mxu1 %v130_v33 }
  0xe2   :  { %v306_v35 = vpop.f32.mrf.mxu0 }
  0xe3   :  { %v117_v36 = vadd.f32 %v306_v35, %v234_v34 }
  0xe4   :  { %v111_v37 = vpop.f32.mrf.mxu0 }
  0xe5   :  { %v123_v38 = vmul.f32 0.70710677, %v117_v36  ;;  %v112_v39 = vadd.f32 %v234_v34, %v111_v37  ;;  %v121_v46 = vmul.f32 0.5, %v117_v36 }
  0xe7   :  { %342 = verf.f32 %v123_v38  ;;  %v122_v40 = vmul.f32 0.70710677, %v112_v39  ;;  %v120_v44 = vmul.f32 0.5, %v112_v39 }
  0xe9   :  { %344 = verf.f32 %v122_v40 }
  0xf4   :  { %v343_v41 = vpop.eup %342 }
  0xf5   :  { %v127_v43 = vadd.f32 1.0, %v343_v41 }
  0xf6   :  { %v345_v42 = vpop.eup %344 }
  0xf7   :  { %v126_v45 = vadd.f32 1.0, %v345_v42  ;;  %v129_v48 = vmul.f32 %v127_v43, %v121_v46 }
  0xf9   :  { %v128_v47 = vmul.f32 %v126_v45, %v120_v44 }
  0xfb   :  { %339 = vmatprep.mubr.f32.mxu1 %v128_v47 }
  0xfc   :  { %340 = vmatmul.mubr.f32.vlgmr.msra.gmra.mxu1 %v129_v48 }
 0x1bc   :  { %v341_v50 = vpop.f32.mrf.mxu1 }
 0x1bd   :  { %v225_v51 = vadd.f32 %v341_v50, %v235_v49 }
 0x1be   :  { %v219_v52 = vpop.f32.mrf.mxu1 }
 0x1bf   :  { %229 = vst [vmem:[%s495_s5 + $0x8] sm:$0xff] %v225_v51  ;;  %v220_v53 = vadd.f32 %v235_v49, %v219_v52 }
 0x1c1   :  { %228 = vst [vmem:[%s495_s5] sm:$0xff] %v220_v53 }

</bundles_post_ra>
